<compile_context>
chip_gen: v6e
topology: v6e:2x2x1
jax: 0.10.0
libtpu: 0.0.40
codegen_flags: <defaults>
</compile_context>

<pallas_src>
import jax
import jax.numpy as jnp
from jax import lax
from jax.experimental import pallas as pl
from jax.experimental.pallas import tpu as pltpu


# ------------------------------------------------------------------ kernel ---
def _axc_conv_kernel(mu_ref, x_ref, w_ref, o_ref):
    """One (batch, L-tile) grid step.

    mu_ref: (1, 1)  SMEM        precomputed mean(|W|)
    x_ref : (1, CKK_p, TL)      im2col patches for this batch element / L tile
    w_ref : (NCHUNKS, O, CHUNK) chunked flattened weights (resident, constant)
    o_ref : (1, O, TL)          output tile
    """
    nchunks, o_dim, chunk = w_ref.shape
    tl = x_ref.shape[-1]
    mu = mu_ref[0, 0]

    def chunk_body(i, acc):
        # dynamic sublane slice of the x tile; start is a multiple of `chunk`
        base = pl.multiple_of(i * chunk, chunk)
        x_ck = x_ref[0, pl.ds(base, chunk), :]          # (CHUNK, TL)
        w_ck = w_ref[i]                                 # (O, CHUNK)
        # bounded intermediate: (O, CHUNK, TL) — never the full CKK broadcast
        m = jnp.minimum(w_ck[:, :, None], x_ck[None, :, :])
        return acc + jnp.sum(m, axis=1)                 # (O, TL)

    acc = lax.fori_loop(0, nchunks, chunk_body,
                        jnp.zeros((o_dim, tl), jnp.float32),
                        unroll=True)

    o_ref[0] = (mu * acc).astype(o_ref.dtype)


# ------------------------------------------------------------------- glue ----
def _unfold_nchw(x, kernel_size, stride, padding):
    """Equivalent of torch.nn.functional.unfold for NCHW input.

    Returns (N, C*K*K, L) with PyTorch ordering: row index = c*K*K + kh*K + kw.
    """
    n, c, h, w = x.shape
    k = kernel_size
    xp = jnp.pad(x, ((0, 0), (0, 0), (padding, padding), (padding, padding)))
    oh = (h + 2 * padding - k) // stride + 1
    ow = (w + 2 * padding - k) // stride + 1
    cols = []
    for kh in range(k):
        for kw in range(k):
            patch = xp[:, :, kh:kh + stride * oh:stride, kw:kw + stride * ow:stride]
            cols.append(patch.reshape(n, c, oh * ow))          # (N, C, L)
    x_unf = jnp.stack(cols, axis=2)                            # (N, C, K*K, L)
    return x_unf.reshape(n, c * k * k, oh * ow), oh, ow


def approximate_conv2d(x, weights, *, stride=1, padding=0, tile_l=512, chunk=8):
    """Forward pass of ApproximateConv2d.  x: (N, C, H, W), weights: (O, C, K, K)."""
    n, c, h, w = x.shape
    o, ci, k, _ = weights.shape
    assert ci == c

    x_unf, oh, ow = _unfold_nchw(x, k, stride, padding)        # (N, CKK, L)
    ckk = c * k * k
    l = oh * ow

    # mean(|W|) hoisted out of the kernel: computed once, passed via SMEM.
    mu = jnp.mean(jnp.abs(weights)).astype(jnp.float32).reshape(1, 1)

    # Pad the reduction axis to a multiple of the chunk size.  Padded rows are
    # zero in BOTH x and W, so min(0, 0) = 0 contributes nothing to the sum.
    ckk_p = pl.cdiv(ckk, chunk) * chunk
    nchunks = ckk_p // chunk

    # Lane tile: default 512 (>= 85% of HBM roofline in measured sweeps) but
    # never bigger than the 128-rounded problem size, so small shapes do not
    # over-pad.  Always a multiple of 128 -> unmasked lane-dense stores.
    tile_l = max(128, min(tile_l, pl.cdiv(l, 128) * 128))
    lp = pl.cdiv(l, tile_l) * tile_l

    if ckk_p != ckk or lp != l:
        x_unf = jnp.pad(x_unf, ((0, 0), (0, ckk_p - ckk), (0, lp - l)))
    x_unf = x_unf.astype(jnp.float32)

    w_unf = weights.reshape(o, ckk).astype(jnp.float32)
    if ckk_p != ckk:
        w_unf = jnp.pad(w_unf, ((0, 0), (0, ckk_p - ckk)))
    # (NCHUNKS, O, CHUNK): chunk axis leading so the kernel selects a chunk
    # with a cheap outer-dim index instead of a lane-dim dynamic slice.
    w_chunks = w_unf.reshape(o, nchunks, chunk).transpose(1, 0, 2)

    grid = (n, lp // tile_l)

    # VMEM budget: double-buffered x blocks + double-buffered output blocks +
    # resident (lane-padded) weights + accumulator, with 2x headroom; capped
    # at v7x's 64 MiB physical VMEM, floored at 32 MiB (raises v5e's 16 MiB
    # default scope for large tiles).
    est_bytes = 4 * (2 * ckk_p * tile_l
                     + 2 * o * tile_l
                     + 2 * nchunks * o * max(chunk, 128)
                     + o * tile_l)
    vmem_limit = int(min(64 * 1024 * 1024, max(32 * 1024 * 1024, 2 * est_bytes)))

    out = pl.pallas_call(
        _axc_conv_kernel,
        out_shape=jax.ShapeDtypeStruct((n, o, lp), jnp.float32),
        grid_spec=pltpu.PrefetchScalarGridSpec(
            num_scalar_prefetch=0,
            grid=grid,
            in_specs=[
                pl.BlockSpec(memory_space=pltpu.MemorySpace.SMEM),          # mu
                pl.BlockSpec((1, ckk_p, tile_l), lambda b, j: (b, 0, j)),   # x tile
                pl.BlockSpec((nchunks, o, chunk), lambda b, j: (0, 0, 0)),  # W (resident)
            ],
            out_specs=pl.BlockSpec((1, o, tile_l), lambda b, j: (b, 0, j)),
        ),
        compiler_params=pltpu.CompilerParams(
            dimension_semantics=("parallel", "parallel"),
            vmem_limit_bytes=vmem_limit,
        ),
    )(mu, x_unf, w_chunks)

    return out[:, :, :l].reshape(n, o, oh, ow)


# -------------------------------------------------------------- reference ----
def _reference(x, weights, *, stride=1, padding=0):
    n = x.shape[0]
    o = weights.shape[0]
    k = weights.shape[-1]
    x_unf, oh, ow = _unfold_nchw(x, k, stride, padding)        # (N, CKK, L)
    w_unf = weights.reshape(o, -1)                             # (O, CKK)
    mu_w = jnp.mean(jnp.abs(weights))
    m = jnp.minimum(x_unf[:, None, :, :], w_unf[None, :, :, None])  # (N, O, CKK, L)
    z = mu_w * jnp.sum(m, axis=2)                              # (N, O, L)
    return z.reshape(n, o, oh, ow)


# ------------------------------------------------------------------- main ----
if __name__ == "__main__":
    key = jax.random.PRNGKey(0)
    k_x, k_w = jax.random.split(key)

    batch, in_channels, out_channels = 2, 4, 8
    spatial, kernel_size, stride, padding = 16, 3, 1, 1

    x = jax.random.normal(k_x, (batch, in_channels, spatial, spatial), jnp.float32)
    # nn.Parameter(torch.randn(O, C, K, K)) -> standard normal init
    weights = jax.random.normal(
        k_w, (out_channels, in_channels, kernel_size, kernel_size), jnp.float32)

    z = approximate_conv2d(x, weights, stride=stride, padding=padding)
    z = jax.block_until_ready(z)

    z_ref = _reference(x, weights, stride=stride, padding=padding)
    assert z.shape == (batch, out_channels, spatial, spatial)
    assert jnp.allclose(z, z_ref, atol=1e-5, rtol=1e-5), "mismatch vs JAX reference"

    print("KERNEL_OK")
</pallas_src>

<mosaic_0001>
module attributes {stable_mosaic.version = 11 : i64} {
  func.func @_axc_conv_kernel(%arg0: i32, %arg1: i32, %arg2: memref<1x1xf32, #tpu.memory_space<smem>>, %arg3: memref<1x40x256xf32, #tpu.memory_space<vmem>>, %arg4: memref<5x8x8xf32, #tpu.memory_space<vmem>>, %arg5: memref<1x8x256xf32, #tpu.memory_space<vmem>>) attributes {dimension_semantics = [#tpu.dimension_semantics<parallel>, #tpu.dimension_semantics<parallel>], iteration_bounds = array<i64: 2, 1>, scalar_prefetch = 0 : i64, scratch_operands = 0 : i64, tpu.core_type = #tpu.core_type<tc>, window_params = [{transform_indices = @transform_0, window_bounds = array<i64: 1, 1>}, {transform_indices = @transform_1, window_bounds = array<i64: 1, 40, 256>}, {pipeline_mode = #tpu.pipeline_mode<synchronous>, transform_indices = @transform_2, window_bounds = array<i64: 5, 8, 8>}, {transform_indices = @transform_3, window_bounds = array<i64: 1, 8, 256>}]} {
    %c0 = arith.constant 0 : index
    %c0_0 = arith.constant 0 : index
    %0 = memref.load %arg2[%c0, %c0_0] : memref<1x1xf32, #tpu.memory_space<smem>>
    %cst = arith.constant 0.000000e+00 : f32
    %1 = vector.broadcast %cst : f32 to vector<8x256xf32>
    %c0_i32 = arith.constant 0 : i32
    %c8_i32 = arith.constant 8 : i32
    %2 = arith.muli %c0_i32, %c8_i32 : i32
    %3 = tpu.assume_multiple %2, 8 : i32
    %c0_1 = arith.constant 0 : index
    %4 = arith.index_cast %3 : i32 to index
    %c0_2 = arith.constant 0 : index
    %5 = vector.load %arg3[%c0_1, %4, %c0_2] : memref<1x40x256xf32, #tpu.memory_space<vmem>>, vector<1x8x256xf32>
    %6 = vector.shape_cast %5 : vector<1x8x256xf32> to vector<8x256xf32>
    %7 = arith.index_cast %c0_i32 : i32 to index
    %c0_3 = arith.constant 0 : index
    %c0_4 = arith.constant 0 : index
    %8 = vector.load %arg4[%7, %c0_3, %c0_4] : memref<5x8x8xf32, #tpu.memory_space<vmem>>, vector<1x8x8xf32>
    %9 = vector.shape_cast %8 : vector<1x8x8xf32> to vector<8x8xf32>
    %10 = vector.shape_cast %9 : vector<8x8xf32> to vector<8x8x1xf32>
    %11 = vector.shape_cast %6 : vector<8x256xf32> to vector<1x8x256xf32>
    %12 = vector.broadcast %10 : vector<8x8x1xf32> to vector<8x8x256xf32>
    %13 = vector.broadcast %11 : vector<1x8x256xf32> to vector<8x8x256xf32>
    %14 = arith.minimumf %12, %13 : vector<8x8x256xf32>
    %cst_5 = arith.constant dense<0.000000e+00> : vector<8x256xf32>
    %15 = vector.multi_reduction <add>, %14, %cst_5 [1] : vector<8x8x256xf32> to vector<8x256xf32>
    %16 = arith.addf %1, %15 : vector<8x256xf32>
    %c1_i32 = arith.constant 1 : i32
    %c8_i32_6 = arith.constant 8 : i32
    %17 = arith.muli %c1_i32, %c8_i32_6 : i32
    %18 = tpu.assume_multiple %17, 8 : i32
    %c0_7 = arith.constant 0 : index
    %19 = arith.index_cast %18 : i32 to index
    %c0_8 = arith.constant 0 : index
    %20 = vector.load %arg3[%c0_7, %19, %c0_8] : memref<1x40x256xf32, #tpu.memory_space<vmem>>, vector<1x8x256xf32>
    %21 = vector.shape_cast %20 : vector<1x8x256xf32> to vector<8x256xf32>
    %22 = arith.index_cast %c1_i32 : i32 to index
    %c0_9 = arith.constant 0 : index
    %c0_10 = arith.constant 0 : index
    %23 = vector.load %arg4[%22, %c0_9, %c0_10] : memref<5x8x8xf32, #tpu.memory_space<vmem>>, vector<1x8x8xf32>
    %24 = vector.shape_cast %23 : vector<1x8x8xf32> to vector<8x8xf32>
    %25 = vector.shape_cast %24 : vector<8x8xf32> to vector<8x8x1xf32>
    %26 = vector.shape_cast %21 : vector<8x256xf32> to vector<1x8x256xf32>
    %27 = vector.broadcast %25 : vector<8x8x1xf32> to vector<8x8x256xf32>
    %28 = vector.broadcast %26 : vector<1x8x256xf32> to vector<8x8x256xf32>
    %29 = arith.minimumf %27, %28 : vector<8x8x256xf32>
    %cst_11 = arith.constant dense<0.000000e+00> : vector<8x256xf32>
    %30 = vector.multi_reduction <add>, %29, %cst_11 [1] : vector<8x8x256xf32> to vector<8x256xf32>
    %31 = arith.addf %16, %30 : vector<8x256xf32>
    %c2_i32 = arith.constant 2 : i32
    %c8_i32_12 = arith.constant 8 : i32
    %32 = arith.muli %c2_i32, %c8_i32_12 : i32
    %33 = tpu.assume_multiple %32, 8 : i32
    %c0_13 = arith.constant 0 : index
    %34 = arith.index_cast %33 : i32 to index
    %c0_14 = arith.constant 0 : index
    %35 = vector.load %arg3[%c0_13, %34, %c0_14] : memref<1x40x256xf32, #tpu.memory_space<vmem>>, vector<1x8x256xf32>
    %36 = vector.shape_cast %35 : vector<1x8x256xf32> to vector<8x256xf32>
    %37 = arith.index_cast %c2_i32 : i32 to index
    %c0_15 = arith.constant 0 : index
    %c0_16 = arith.constant 0 : index
    %38 = vector.load %arg4[%37, %c0_15, %c0_16] : memref<5x8x8xf32, #tpu.memory_space<vmem>>, vector<1x8x8xf32>
    %39 = vector.shape_cast %38 : vector<1x8x8xf32> to vector<8x8xf32>
    %40 = vector.shape_cast %39 : vector<8x8xf32> to vector<8x8x1xf32>
    %41 = vector.shape_cast %36 : vector<8x256xf32> to vector<1x8x256xf32>
    %42 = vector.broadcast %40 : vector<8x8x1xf32> to vector<8x8x256xf32>
    %43 = vector.broadcast %41 : vector<1x8x256xf32> to vector<8x8x256xf32>
    %44 = arith.minimumf %42, %43 : vector<8x8x256xf32>
    %cst_17 = arith.constant dense<0.000000e+00> : vector<8x256xf32>
    %45 = vector.multi_reduction <add>, %44, %cst_17 [1] : vector<8x8x256xf32> to vector<8x256xf32>
    %46 = arith.addf %31, %45 : vector<8x256xf32>
    %c3_i32 = arith.constant 3 : i32
    %c8_i32_18 = arith.constant 8 : i32
    %47 = arith.muli %c3_i32, %c8_i32_18 : i32
    %48 = tpu.assume_multiple %47, 8 : i32
    %c0_19 = arith.constant 0 : index
    %49 = arith.index_cast %48 : i32 to index
    %c0_20 = arith.constant 0 : index
    %50 = vector.load %arg3[%c0_19, %49, %c0_20] : memref<1x40x256xf32, #tpu.memory_space<vmem>>, vector<1x8x256xf32>
    %51 = vector.shape_cast %50 : vector<1x8x256xf32> to vector<8x256xf32>
    %52 = arith.index_cast %c3_i32 : i32 to index
    %c0_21 = arith.constant 0 : index
    %c0_22 = arith.constant 0 : index
    %53 = vector.load %arg4[%52, %c0_21, %c0_22] : memref<5x8x8xf32, #tpu.memory_space<vmem>>, vector<1x8x8xf32>
    %54 = vector.shape_cast %53 : vector<1x8x8xf32> to vector<8x8xf32>
    %55 = vector.shape_cast %54 : vector<8x8xf32> to vector<8x8x1xf32>
    %56 = vector.shape_cast %51 : vector<8x256xf32> to vector<1x8x256xf32>
    %57 = vector.broadcast %55 : vector<8x8x1xf32> to vector<8x8x256xf32>
    %58 = vector.broadcast %56 : vector<1x8x256xf32> to vector<8x8x256xf32>
    %59 = arith.minimumf %57, %58 : vector<8x8x256xf32>
    %cst_23 = arith.constant dense<0.000000e+00> : vector<8x256xf32>
    %60 = vector.multi_reduction <add>, %59, %cst_23 [1] : vector<8x8x256xf32> to vector<8x256xf32>
    %61 = arith.addf %46, %60 : vector<8x256xf32>
    %c4_i32 = arith.constant 4 : i32
    %c8_i32_24 = arith.constant 8 : i32
    %62 = arith.muli %c4_i32, %c8_i32_24 : i32
    %63 = tpu.assume_multiple %62, 8 : i32
    %c0_25 = arith.constant 0 : index
    %64 = arith.index_cast %63 : i32 to index
    %c0_26 = arith.constant 0 : index
    %65 = vector.load %arg3[%c0_25, %64, %c0_26] : memref<1x40x256xf32, #tpu.memory_space<vmem>>, vector<1x8x256xf32>
    %66 = vector.shape_cast %65 : vector<1x8x256xf32> to vector<8x256xf32>
    %67 = arith.index_cast %c4_i32 : i32 to index
    %c0_27 = arith.constant 0 : index
    %c0_28 = arith.constant 0 : index
    %68 = vector.load %arg4[%67, %c0_27, %c0_28] : memref<5x8x8xf32, #tpu.memory_space<vmem>>, vector<1x8x8xf32>
    %69 = vector.shape_cast %68 : vector<1x8x8xf32> to vector<8x8xf32>
    %70 = vector.shape_cast %69 : vector<8x8xf32> to vector<8x8x1xf32>
    %71 = vector.shape_cast %66 : vector<8x256xf32> to vector<1x8x256xf32>
    %72 = vector.broadcast %70 : vector<8x8x1xf32> to vector<8x8x256xf32>
    %73 = vector.broadcast %71 : vector<1x8x256xf32> to vector<8x8x256xf32>
    %74 = arith.minimumf %72, %73 : vector<8x8x256xf32>
    %cst_29 = arith.constant dense<0.000000e+00> : vector<8x256xf32>
    %75 = vector.multi_reduction <add>, %74, %cst_29 [1] : vector<8x8x256xf32> to vector<8x256xf32>
    %76 = arith.addf %61, %75 : vector<8x256xf32>
    %c5_i32 = arith.constant 5 : i32
    %77 = vector.broadcast %0 : f32 to vector<8x256xf32>
    %78 = arith.mulf %77, %76 : vector<8x256xf32>
    %c0_30 = arith.constant 0 : index
    %c0_31 = arith.constant 0 : index
    %c0_32 = arith.constant 0 : index
    %79 = vector.load %arg5[%c0_30, %c0_31, %c0_32] : memref<1x8x256xf32, #tpu.memory_space<vmem>>, vector<1x8x256xf32>
    %80 = vector.shape_cast %79 : vector<1x8x256xf32> to vector<8x256xf32>
    %81 = vector.shape_cast %78 : vector<8x256xf32> to vector<1x8x256xf32>
    tpu.vector_store %arg5[%c0_30, %c0_31, %c0_32], %81 {strides = array<i32>} : memref<1x8x256xf32, #tpu.memory_space<vmem>>, vector<1x8x256xf32>,
    return
  }
  func.func @transform_0(%arg0: i32, %arg1: i32) -> (i32, i32) {
    %c0_i32 = arith.constant 0 : i32
    %c0_i32_0 = arith.constant 0 : i32
    %c0_i32_1 = arith.constant 0 : i32
    return %c0_i32, %c0_i32_0 : i32, i32
  }
  func.func @transform_1(%arg0: i32, %arg1: i32) -> (i32, i32, i32) {
    %c0_i32 = arith.constant 0 : i32
    %c0_i32_0 = arith.constant 0 : i32
    return %arg0, %c0_i32, %arg1 : i32, i32, i32
  }
  func.func @transform_2(%arg0: i32, %arg1: i32) -> (i32, i32, i32) {
    %c0_i32 = arith.constant 0 : i32
    %c0_i32_0 = arith.constant 0 : i32
    %c0_i32_1 = arith.constant 0 : i32
    %c0_i32_2 = arith.constant 0 : i32
    return %c0_i32, %c0_i32_0, %c0_i32_1 : i32, i32, i32
  }
  func.func @transform_3(%arg0: i32, %arg1: i32) -> (i32, i32, i32) {
    %c0_i32 = arith.constant 0 : i32
    %c0_i32_0 = arith.constant 0 : i32
    return %arg0, %c0_i32, %arg1 : i32, i32, i32
  }
}

</mosaic_0001>

<bundles_post_ra>
// kernel: tpu_custom_call.1
= control target key start
LH: loop header
LB: loop body
LE: loop exit
PB: predicated region body
PF: predicated region fallthrough
CT: control target
= control target key end

     0   :  { %s2104_s0 = inlined_call_operand.<no memory space> [shape: f32[1,1], index: 0, kind: input, shape index: {}]   ;;  %s2105_s1 = inlined_call_operand.hbm [shape: f32[2,40,256], index: 1, kind: input, shape index: {}]   ;;  %s2106_s2 = inlined_call_operand.hbm [shape: f32[5,8,8], index: 2, kind: input, shape index: {}]   ;;  %s2107_s3 = inlined_call_operand.hbm [shape: f32[2,8,256], index: 3, kind: output, shape index: {}]  }
   0x1   :  { %8 = sst [smem:[#allocation2]] %s2104_s0 }
   0x2   :  { %9 = vsyncpa [#allocation4], 0 }
   0x3   :  { %11 = vsyncpa [#allocation4 + $0x1], 0 }
   0x4   :  { %12 = vsyncpa [#allocation7], 0 }
   0x5   :  { %13 = vsyncpa [#allocation5], 0 }
   0x6   :  { %15 = vsyncpa [#allocation5 + $0x1], 0  ;;  %s1626_s14 = smov 0   ;;  %s1628_s15 = smov 0  }
   0x7   :  { %s1630_s16 = smov 0   ;;  %s1632_s17 = smov 0  }
   0x8   :  { %s1634_s18 = smov 0   ;;  %s1636_s19 = smov 0  }
   0x9 LB: > { %s1353_s0 = sadd.s32 4294967295, %s1594_s19   ;;  %s1354_s20 = sadd.s32 4294967294, %s1594_s19   ;;  %s1594_s19 = sphi %s1636_s19, %s21_s19   ;;  %s1590_s18 = sphi %s1634_s18, %s2128_s18   ;;  %s1586_s17 = sphi %s1632_s17, %s2127_s17   ;;  %s1582_s16 = sphi %s1630_s16, %s2126_s16   ;;  %s1578_s15 = sphi %s1628_s15, %s2125_s15   ;;  %s1574_s14 = sphi %s1626_s14, %s2124_s14  }
   0xa   : > { %p76_p0 = scmp.ne.s32.totalorder %s1578_s15, %s1574_s14  ;;  %p1660_p1 = scmp.eq.s32.totalorder %s1353_s0, 0 }
   0xb   : > { %p1664_p2 = scmp.eq.s32.totalorder %s1353_s0, 1  ;;  %p129_p3 = scmp.eq.s32.totalorder %s1354_s20, 1 }
   0xc   : > { %p1670_p4 = por %p1660_p1, %p76_p0  ;;  %p1355_p5 = scmp.ge.s32.totalorder %s1594_s19, 1 }
   0xd   : > { %p1675_p6 = por %p129_p3, %p76_p0  ;;  %p136_p7 = scmp.lt.s32.totalorder %s1594_s19, 3 }
   0xe   : > { %s2112_s23 = scalar_select %p1670_p4, 1, 0 }
   0xf   : > { %s2113_s24 = scalar_select %p1675_p6, 1, 0 }
  0x10   : > { %p1680_p8 = pnand %p1355_p5, %p136_p7  ;;  %s1596_s26 = smov [#allocation6]  }
  0x11   : > { %s151_s27 = sshll.u32 %s1596_s26, 4  ;;  %p1357_p10 = scmp.ge.s32.totalorder %s1594_s19, 2  ;;  %s152_s27 = int_to_ptr.vmem [resolvable:$true] %s151_s27 }
  0x12   : > { %p1387_p9 = pneg %p1680_p8  ;;  %s33_s29 = sadd.s32 1, %s1590_s18 }
  0x13   : > { %s1467_s30 = scalar_lea.vmem %s152_s27, 640  ;;  %p1475_p5 = scmp.lt.s32.totalorder %s152_s27, %s152_s27 }
  0x14   : > { %p1689_p11 = pnand %p1387_p9, %p1660_p1  ;;  %p1468_p13 = scmp.ne.s32.totalorder %s152_s27, %s1467_s30 }
  0x15   : > { %p1476_p7 = scmp.lt.s32.totalorder %s1467_s30, %s1467_s30 }
  0x16   : > { %p1458_p12 = pneg %p1689_p11 }
  0x17   : > { %p1477_p6 = por %p1476_p7, %p1475_p5 }
  0x18   : > { %p1470_p0 = pnand %p1468_p13, %p1458_p12 }
  0x1a   : > { %p1471_p3 = pneg %p1470_p0 }
  0x1c   : > { %p1478_p4 = pnand %p1477_p6, %p1471_p3 }
  0x1e   : > { %1481 = shalt.err (!%p1478_p4)
}
  0x1f   : > { %s1597_s4 = smov 128   ;;  %s1598_s5 = smov 8  }
  0x20   : > { %1390 = dma.hbm_to_vmem [thread:$0]  (!%p1689_p11), %s2106_s2, 640, %s152_s27, [#allocation7], %s1597_s4, %s1597_s4, %s1598_s5  }
  0x21   : > { %p35_p6 = scmp.ge.s32.totalorder %s33_s29, 2  ;;  %s63_s8 = sadd.s32 1, %s1582_s16 }
  0x22   : > { %p70_p4 = scmp.ne.s32.totalorder %s1582_s16, %s1578_s15  ;;  %p71_p9 = scmp.eq.s32.totalorder %s1594_s19, 0 }
  0x23   : > { %s2130_s29 = smov (%p35_p6, %s33_s29), 0  ;;  %p1400_p0 = scmp.lt.s32.totalorder %s1594_s19, 2 }
  0x24   : > { %p72_p12 = por %p71_p9, %p70_p4  ;;  %p1709_p13 = por %p1664_p2, %p70_p4 }
  0x25   : > { %s58_s10 = ssub.s32 %s1590_s18, %s2130_s29  ;;  %s165_s11 = sand.u32 1, %s1582_s16  }
  0x26   : > { %p61_p3 = scmp.eq.s32.totalorder %s58_s10, 0  ;;  %s1376_s12 = smul.u32 80, %s165_s11 }
  0x27   : > { %s1377_s0 = smul.u32 1280, %s1590_s18  ;;  %p1721_p11 = pnand %p1400_p0, %p72_p12 }
  0x28   : > { %s1718_s13 = scalar_select %p61_p3, %s1582_s16, %s63_s8  }
  0x29   : > { %s169_s20 = scalar_lea.vmem [#allocation3], %s1376_s12  ;;  %s177_s30 = scalar_lea.hbm %s2105_s1, %s1377_s0 }
  0x2a   : > { %s178_s26 = sshll.u32 %s169_s20, 4  ;;  %s166_s4 = scalar_lea.sflag [#allocation4], %s165_s11  ;;  %s179_s26 = int_to_ptr.vmem [resolvable:$true] %s178_s26 }
  0x2b   : > { %p1484_p2 = pneg %p1721_p11  ;;  %s1495_s5 = scalar_lea.vmem %s179_s26, 1280 }
  0x2c   : > { %p1496_p5 = scmp.ne.s32.totalorder %s179_s26, %s1495_s5  ;;  %s1599_s6 = smov [#allocation3]  }
  0x2d   : > { %s1500_s7 = sshll.u32 %s1599_s6, 4  ;;  %s1501_s7 = int_to_ptr.vmem [resolvable:$false] %s1500_s7 }
  0x2e   : > { %p1498_p7 = pnand %p1496_p5, %p1484_p2  ;;  %s1502_s8 = scalar_lea.vmem %s1501_s7, 2560 }
  0x2f   : > { %p1503_p4 = scmp.lt.s32.totalorder %s179_s26, %s1501_s7  ;;  %p1504_p9 = scmp.lt.s32.totalorder %s1502_s8, %s1495_s5 }
  0x30   : > { %p1499_p6 = pneg %p1498_p7 }
  0x31   : > { %p1505_p12 = por %p1504_p9, %p1503_p4 }
  0x33   : > { %p1506_p0 = pnand %p1505_p12, %p1499_p6 }
  0x35   : > { %1509 = shalt.err (!%p1506_p0)
}
  0x36   : > { %s1600_s10 = smov 256   ;;  %s1601_s12 = smov 16  }
  0x37   : > { %1394 = dma.hbm_to_vmem [thread:$0]  (!%p1721_p11), %s177_s30, 1280, %s179_s26, %s166_s4, %s1600_s10, %s1600_s10, %s1601_s12  }
  0x38   : > { %190 = sbr.rel (%p1680_p8) target bundleno = 372 (0x174), region = 32 }
  0x3d   : > { %s1735_s11 = sand.u32 1, %s1578_s15   ;;  %p2118_p3 = scmp.ne.s32.totalorder %s2112_s23, 0 }
  0x3e   : > { %s1378_s0 = smul.u32 80, %s1735_s11  ;;  %s193_s20 = scalar_lea.sflag [#allocation4], %s1735_s11 }
  0x40   : > { %s1739_s28 = scalar_lea.vmem [#allocation3], %s1378_s0 }
  0x41   : > { %1561 = dma.done.wait (%p2118_p3), %s193_s20, 1280  }
  0x42   : > { %1563 = vsyncadd (%p2118_p3), %s193_s20, 4294966016 }
  0x43   : > { %1565 = dma.done.wait (%p1660_p1), [#allocation7], 640  }
  0x44   : > { %1567 = vsyncadd (%p1660_p1), [#allocation7], 4294966656  ;;  %v232_v0 = vlaneseq  ;;  %v422_v4 = vld [vmem:[#allocation6 + $0x8] sm:$0xff]  ;;  %v231_v5 = vld [vmem:[#allocation6] sm:$0xff]  ;;  %s1807_s21 = sld [smem:[#allocation2]]  ;;  %vm1213_vm0 = vcmask 1041409  }
  0x45   : > { %v613_v16 = vld [vmem:[#allocation6 + $0x10] sm:$0xff]  ;;  %v804_v27 = vld [vmem:[#allocation6 + $0x18] sm:$0xff]  ;;  %v995_v40 = vld [vmem:[#allocation6 + $0x20] sm:$0xff]  ;;  %vm1215_vm1 = vcmask 1042434   ;;  %vm1217_vm2 = vcmask 1043459   ;;  %vm1219_vm3 = vcmask 1044484  }
  0x46   : > { %v233_v1 = vshrl.u32 %v232_v0, 7  ;;  %v1778_v55 = vld [vmem:[%s1739_s28 + $0x10] sm:$0xff]  ;;  %v1781_v56 = vld [vmem:[%s1739_s28 + $0x18] sm:$0xff]  ;;  %v1784_v57 = vld [vmem:[%s1739_s28] sm:$0xff]  ;;  %s1361_s23 = sshll.u32 %s1735_s11, 4  ;;  %vm1221_vm4 = vcmask 1045509  }
  0x47   : > { %v1787_v58 = vld [vmem:[%s1739_s28 + $0x8] sm:$0xff]  ;;  %vm1223_vm5 = vcmask 1046534   ;;  %s1375_s25 = sshll.u32 %s1586_s17, 8  ;;  %s222_s26 = scalar_lea.vmem [#allocation8], %s1361_s23  ;;  %vm1225_vm6 = vcmask 1047559  }
  0x48   : > { %v1749_v2 = vsub.s32 0, %v233_v1  ;;  %v1751_v3 = vsub.s32 1, %v233_v1  ;;  %v1757_v10 = vsub.s32 2, %v233_v1  ;;  %v1761_v13 = vsub.s32 3, %v233_v1  ;;  %s1255_s27 = sshll.u32 %s222_s26, 4  ;;  %s2056_s4 = scalar_lea.hbm %s2107_s3, %s1375_s25  ;;  %s2058_s27 = int_to_ptr.vmem [resolvable:$true] %s1255_s27 }
  0x49   : > { %v262_v19 = vsub.s32 4, %v233_v1  ;;  %v269_v22 = vsub.s32 5, %v233_v1  ;;  %v276_v30 = vsub.s32 6, %v233_v1  ;;  %v283_v35 = vsub.s32 7, %v233_v1  ;;  %s1239_s17 = scalar_lea.sflag [#allocation5], %s1735_s11  ;;  %s1510_s5 = scalar_lea.vmem %s2058_s27, 256 }
  0x4a   : > { %v426_v6 = vrot.slane %v422_v4, %v1749_v2  ;;  %v235_v7 = vrot.slane %v231_v5, %v1749_v2  ;;  %v433_v8 = vrot.slane %v422_v4, %v1751_v3  ;;  %v242_v9 = vrot.slane %v231_v5, %v1751_v3  ;;  %p1511_p1 = scmp.ne.s32.totalorder %s2058_s27, %s1510_s5  ;;  %s1602_s6 = smov [#allocation8]  }
  0x4b   : > { %v440_v11 = vrot.slane %v422_v4, %v1757_v10  ;;  %v249_v12 = vrot.slane %v231_v5, %v1757_v10  ;;  %v447_v14 = vrot.slane %v422_v4, %v1761_v13  ;;  %v256_v15 = vrot.slane %v231_v5, %v1761_v13  ;;  %s1514_s7 = sshll.u32 %s1602_s6, 4  ;;  %s1515_s7 = int_to_ptr.vmem [resolvable:$false] %s1514_s7 }
  0x4c   : > { %428 = vbcast.lane.b32.xlu1 %v426_v6, 256  ;;  %237 = vbcast.lane.b32.xlu0 %v235_v7, 256  ;;  %v624_v17 = vrot.slane %v613_v16, %v1751_v3  ;;  %v617_v18 = vrot.slane %v613_v16, %v1749_v2  ;;  %v454_v20 = vrot.slane %v422_v4, %v262_v19  ;;  %p1512_p8 = pnand %p1511_p1, %p1709_p13  ;;  %s1516_s8 = scalar_lea.vmem %s1515_s7, 512 }
  0x4d   : > { %v263_v21 = vrot.slane %v231_v5, %v262_v19  ;;  %v270_v23 = vrot.slane %v231_v5, %v269_v22  ;;  %v631_v24 = vrot.slane %v613_v16, %v1757_v10  ;;  %v638_v25 = vrot.slane %v613_v16, %v1761_v13  ;;  %p1517_p2 = scmp.lt.s32.totalorder %s2058_s27, %s1515_s7  ;;  %p1518_p5 = scmp.lt.s32.totalorder %s1516_s8, %s1510_s5 }
  0x4e   : > { %v461_v26 = vrot.slane %v422_v4, %v269_v22  ;;  %v815_v28 = vrot.slane %v804_v27, %v1751_v3  ;;  %v808_v29 = vrot.slane %v804_v27, %v1749_v2  ;;  %v468_v31 = vrot.slane %v422_v4, %v276_v30  ;;  %p1513_p11 = pneg %p1512_p8 }
  0x4f   : > { %v277_v32 = vrot.slane %v231_v5, %v276_v30  ;;  %v822_v33 = vrot.slane %v804_v27, %v1757_v10  ;;  %v645_v34 = vrot.slane %v613_v16, %v262_v19  ;;  %v475_v36 = vrot.slane %v422_v4, %v283_v35  ;;  %p1519_p7 = por %p1518_p5, %p1517_p2 }
  0x50   : > { %435 = vbcast.lane.b32.xlu1 %v433_v8, 256  ;;  %244 = vbcast.lane.b32.xlu0 %v242_v9, 256  ;;  %v284_v37 = vrot.slane %v231_v5, %v283_v35  ;;  %v829_v38 = vrot.slane %v804_v27, %v1761_v13  ;;  %v652_v39 = vrot.slane %v613_v16, %v269_v22 }
  0x51   : > { %v1006_v41 = vrot.slane %v995_v40, %v1751_v3  ;;  %v999_v42 = vrot.slane %v995_v40, %v1749_v2  ;;  %v836_v43 = vrot.slane %v804_v27, %v262_v19  ;;  %v659_v44 = vrot.slane %v613_v16, %v276_v30  ;;  %p1520_p6 = pnand %p1519_p7, %p1513_p11 }
  0x52   : > { %v666_v45 = vrot.slane %v613_v16, %v283_v35  ;;  %v1013_v46 = vrot.slane %v995_v40, %v1757_v10  ;;  %v1020_v47 = vrot.slane %v995_v40, %v1761_v13  ;;  %v843_v48 = vrot.slane %v804_v27, %v269_v22 }
  0x53   : > { %v1027_v49 = vrot.slane %v995_v40, %v262_v19  ;;  %v850_v50 = vrot.slane %v804_v27, %v276_v30  ;;  %v1034_v51 = vrot.slane %v995_v40, %v269_v22  ;;  %v857_v52 = vrot.slane %v804_v27, %v283_v35 }
  0x54   : > { %442 = vbcast.lane.b32.xlu1 %v440_v11, 256  ;;  %251 = vbcast.lane.b32.xlu0 %v249_v12, 256  ;;  %v1048_v53 = vrot.slane %v995_v40, %v283_v35  ;;  %v1041_v54 = vrot.slane %v995_v40, %v276_v30 }
  0x58   : > { %449 = vbcast.lane.b32.xlu1 %v447_v14, 256  ;;  %258 = vbcast.lane.b32.xlu0 %v256_v15, 256 }
  0x5c   : > { %626 = vbcast.lane.b32.xlu1 %v624_v17, 256  ;;  %619 = vbcast.lane.b32.xlu0 %v617_v18, 256 }
  0x60   : > { %456 = vbcast.lane.b32.xlu1 %v454_v20, 256  ;;  %265 = vbcast.lane.b32.xlu0 %v263_v21, 256 }
  0x64   : > { %272 = vbcast.lane.b32.xlu1 %v270_v23, 256  ;;  %633 = vbcast.lane.b32.xlu0 %v631_v24, 256 }
  0x68   : > { %640 = vbcast.lane.b32.xlu1 %v638_v25, 256  ;;  %463 = vbcast.lane.b32.xlu0 %v461_v26, 256 }
  0x6c   : > { %817 = vbcast.lane.b32.xlu1 %v815_v28, 256  ;;  %810 = vbcast.lane.b32.xlu0 %v808_v29, 256 }
  0x70   : > { %470 = vbcast.lane.b32.xlu1 %v468_v31, 256  ;;  %279 = vbcast.lane.b32.xlu0 %v277_v32, 256 }
  0x74   : > { %824 = vbcast.lane.b32.xlu1 %v822_v33, 256  ;;  %647 = vbcast.lane.b32.xlu0 %v645_v34, 256 }
  0x78   : > { %477 = vbcast.lane.b32.xlu1 %v475_v36, 256  ;;  %286 = vbcast.lane.b32.xlu0 %v284_v37, 256 }
  0x7c   : > { %831 = vbcast.lane.b32.xlu1 %v829_v38, 256  ;;  %654 = vbcast.lane.b32.xlu0 %v652_v39, 256 }
  0x80   : > { %1008 = vbcast.lane.b32.xlu1 %v1006_v41, 256  ;;  %1001 = vbcast.lane.b32.xlu0 %v999_v42, 256 }
  0x84   : > { %838 = vbcast.lane.b32.xlu1 %v836_v43, 256  ;;  %661 = vbcast.lane.b32.xlu0 %v659_v44, 256 }
  0x88   : > { %668 = vbcast.lane.b32.xlu1 %v666_v45, 256  ;;  %1015 = vbcast.lane.b32.xlu0 %v1013_v46, 256 }
  0x8c   : > { %1022 = vbcast.lane.b32.xlu1 %v1020_v47, 256  ;;  %845 = vbcast.lane.b32.xlu0 %v843_v48, 256 }
  0x90   : > { %1029 = vbcast.lane.b32.xlu1 %v1027_v49, 256  ;;  %852 = vbcast.lane.b32.xlu0 %v850_v50, 256 }
  0x94   : > { %1036 = vbcast.lane.b32.xlu1 %v1034_v51, 256  ;;  %859 = vbcast.lane.b32.xlu0 %v857_v52, 256 }
  0x98   : > { %1050 = vbcast.lane.b32.xlu1 %v1048_v53, 256  ;;  %1043 = vbcast.lane.b32.xlu0 %v1041_v54, 256 }
  0xbe   : > { %v429_v59 = vpop.permute.xlu1 %428  ;;  %v238_v60 = vpop.permute.xlu0 %237 }
  0xbf   : > { %v479_v61 = vmin.f32 %v429_v59, %v1778_v55  ;;  %v480_v62 = vmin.f32 %v429_v59, %v1781_v56  ;;  %v288_v63 = vmin.f32 %v238_v60, %v1784_v57  ;;  %v289_v0 = vmin.f32 %v238_v60, %v1787_v58 }
  0xc1   : > { %v495_v1 = vrot.slane %v479_v61, 4  ;;  %v501_v2 = vrot.slane %v480_v62, 4  ;;  %v304_v3 = vrot.slane %v288_v63, 4  ;;  %v310_v4 = vrot.slane %v289_v0, 4 }
  0xc2   : > { %v436_v9 = vpop.permute.xlu1 %435  ;;  %v245_v14 = vpop.permute.xlu0 %244 }
  0xc3   : > { %v496_v5 = vadd.f32 %v495_v1, %v479_v61  ;;  %v502_v6 = vadd.f32 %v501_v2, %v480_v62  ;;  %v305_v7 = vadd.f32 %v304_v3, %v288_v63  ;;  %v311_v8 = vadd.f32 %v310_v4, %v289_v0 }
  0xc4   : > { %v481_v15 = vmin.f32 %v436_v9, %v1778_v55  ;;  %v482_v16 = vmin.f32 %v436_v9, %v1781_v56  ;;  %v290_v21 = vmin.f32 %v245_v14, %v1784_v57  ;;  %v291_v22 = vmin.f32 %v245_v14, %v1787_v58  ;;  %v1812_v14 = vld [vmem:[%s1739_s28 + $0x20] sm:$0xff] }
  0xc5   : > { %v497_v10 = vrot.slane %v496_v5, 2  ;;  %v503_v11 = vrot.slane %v502_v6, 2  ;;  %v306_v12 = vrot.slane %v305_v7, 2  ;;  %v312_v13 = vrot.slane %v311_v8, 2 }
  0xc6   : > { %v507_v27 = vrot.slane %v481_v15, 4  ;;  %v513_v28 = vrot.slane %v482_v16, 4  ;;  %v316_v33 = vrot.slane %v290_v21, 4  ;;  %v322_v34 = vrot.slane %v291_v22, 4  ;;  %v443_v35 = vpop.permute.xlu1 %442  ;;  %v252_v36 = vpop.permute.xlu0 %251 }
  0xc7   : > { %v498_v17 = vadd.f32 %v497_v10, %v496_v5  ;;  %v504_v18 = vadd.f32 %v503_v11, %v502_v6  ;;  %v307_v19 = vadd.f32 %v306_v12, %v305_v7  ;;  %v313_v20 = vadd.f32 %v312_v13, %v311_v8 }
  0xc8   : > { %v508_v39 = vadd.f32 %v507_v27, %v481_v15  ;;  %v514_v40 = vadd.f32 %v513_v28, %v482_v16  ;;  %v483_v41 = vmin.f32 %v443_v35, %v1778_v55  ;;  %v484_v42 = vmin.f32 %v443_v35, %v1781_v56 }
  0xc9   : > { %v499_v23 = vrot.slane %v498_v17, 1  ;;  %v505_v24 = vrot.slane %v504_v18, 1  ;;  %v308_v25 = vrot.slane %v307_v19, 1  ;;  %v314_v26 = vrot.slane %v313_v20, 1 }
  0xca   : > { %v292_v43 = vmin.f32 %v252_v36, %v1784_v57  ;;  %v293_v44 = vmin.f32 %v252_v36, %v1787_v58  ;;  %v317_v45 = vadd.f32 %v316_v33, %v290_v21  ;;  %v323_v46 = vadd.f32 %v322_v34, %v291_v22  ;;  %v450_v49 = vpop.permute.xlu1 %449  ;;  %v259_v61 = vpop.permute.xlu0 %258 }
  0xcb   : > { %v500_v29 = vadd.f32 %v499_v23, %v498_v17  ;;  %v506_v30 = vadd.f32 %v505_v24, %v504_v18  ;;  %v309_v31 = vadd.f32 %v308_v25, %v307_v19  ;;  %v315_v32 = vadd.f32 %v314_v26, %v313_v20 }
  0xcc   : > { %v509_v47 = vrot.slane %v508_v39, 2  ;;  %v515_v48 = vrot.slane %v514_v40, 2  ;;  %v519_v50 = vrot.slane %v483_v41, 4  ;;  %v525_v51 = vrot.slane %v484_v42, 4 }
  0xcd   : > { %v1797_v37 = vadd.f32 %v500_v29, %v309_v31  ;;  %v1799_v38 = vadd.f32 %v506_v30, %v315_v32  ;;  %v328_v52 = vrot.slane %v292_v43, 4  ;;  %v334_v53 = vrot.slane %v293_v44, 4  ;;  %v1816_v29 = vld [vmem:[%s1739_s28 + $0x28] sm:$0xff] }
  0xce   : > { %v318_v54 = vrot.slane %v317_v45, 2  ;;  %v324_v59 = vrot.slane %v323_v46, 2  ;;  %v485_v60 = vmin.f32 %v450_v49, %v1778_v55  ;;  %v510_v62 = vadd.f32 %v509_v47, %v508_v39  ;;  %v627_v10 = vpop.permute.xlu1 %626  ;;  %v620_v19 = vpop.permute.xlu0 %619 }
  0xcf   : > { %v516_v63 = vadd.f32 %v515_v48, %v514_v40  ;;  %v486_v0 = vmin.f32 %v450_v49, %v1781_v56  ;;  %v520_v1 = vadd.f32 %v519_v50, %v483_v41  ;;  %v526_v2 = vadd.f32 %v525_v51, %v484_v42 }
  0xd0   : > { %v329_v3 = vadd.f32 %v328_v52, %v292_v43  ;;  %v335_v4 = vadd.f32 %v334_v53, %v293_v44  ;;  %v319_v5 = vadd.f32 %v318_v54, %v317_v45  ;;  %v325_v6 = vadd.f32 %v324_v59, %v323_v46 }
  0xd1   : > { %v294_v7 = vmin.f32 %v259_v61, %v1784_v57  ;;  %v295_v8 = vmin.f32 %v259_v61, %v1787_v58  ;;  %v531_v9 = vrot.slane %v485_v60, 4  ;;  %v511_v11 = vrot.slane %v510_v62, 1 }
  0xd2   : > { %v517_v12 = vrot.slane %v516_v63, 1  ;;  %v537_v13 = vrot.slane %v486_v0, 4  ;;  %v521_v15 = vrot.slane %v520_v1, 2  ;;  %v527_v16 = vrot.slane %v526_v2, 2  ;;  %v457_v35 = vpop.permute.xlu1 %456  ;;  %v266_v46 = vpop.permute.xlu0 %265 }
  0xd3   : > { %v330_v17 = vrot.slane %v329_v3, 2  ;;  %v336_v18 = vrot.slane %v335_v4, 2  ;;  %v320_v20 = vrot.slane %v319_v5, 1  ;;  %v326_v21 = vrot.slane %v325_v6, 1 }
  0xd4   : > { %v340_v22 = vrot.slane %v294_v7, 4  ;;  %v346_v23 = vrot.slane %v295_v8, 4  ;;  %v532_v24 = vadd.f32 %v531_v9, %v485_v60  ;;  %v672_v25 = vmin.f32 %v627_v10, %v1812_v14 }
  0xd5   : > { %v512_v26 = vadd.f32 %v511_v11, %v510_v62  ;;  %v518_v27 = vadd.f32 %v517_v12, %v516_v63  ;;  %v538_v28 = vadd.f32 %v537_v13, %v486_v0  ;;  %v1819_v30 = vstv %s1807_s21 }
  0xd6   : > { %2119 = vst [vmem:[#allocation12_spill] sm:$0xff] %v1819_v30  ;;  %v522_v31 = vadd.f32 %v521_v15, %v520_v1  ;;  %v528_v32 = vadd.f32 %v527_v16, %v526_v2  ;;  %v331_v33 = vadd.f32 %v330_v17, %v329_v3  ;;  %v337_v34 = vadd.f32 %v336_v18, %v335_v4  ;;  %v273_v16 = vpop.permute.xlu1 %272 }
  0xd7   : > { %v321_v36 = vadd.f32 %v320_v20, %v319_v5  ;;  %v327_v39 = vadd.f32 %v326_v21, %v325_v6  ;;  %v341_v40 = vadd.f32 %v340_v22, %v294_v7  ;;  %v347_v41 = vadd.f32 %v346_v23, %v295_v8 }
  0xd8   : > { %v533_v42 = vrot.slane %v532_v24, 2  ;;  %v673_v43 = vmin.f32 %v627_v10, %v1816_v29  ;;  %v698_v44 = vrot.slane %v672_v25, 4  ;;  %v670_v45 = vmin.f32 %v620_v19, %v1812_v14 }
  0xd9   : > { %v539_v47 = vrot.slane %v538_v28, 2  ;;  %v671_v48 = vmin.f32 %v620_v19, %v1816_v29  ;;  %v487_v49 = vmin.f32 %v457_v35, %v1778_v55  ;;  %v488_v50 = vmin.f32 %v457_v35, %v1781_v56 }
  0xda   : > { %v523_v51 = vrot.slane %v522_v31, 1  ;;  %v529_v52 = vrot.slane %v528_v32, 1  ;;  %v332_v53 = vrot.slane %v331_v33, 1  ;;  %v338_v54 = vrot.slane %v337_v34, 1 }
  0xdb   : > { %v342_v59 = vrot.slane %v341_v40, 2  ;;  %v348_v60 = vrot.slane %v347_v41, 2  ;;  %v296_v61 = vmin.f32 %v266_v46, %v1784_v57  ;;  %v297_v62 = vmin.f32 %v266_v46, %v1787_v58 }
  0xdc   : > { %v534_v63 = vadd.f32 %v533_v42, %v532_v24  ;;  %v699_v0 = vadd.f32 %v698_v44, %v672_v25  ;;  %v704_v1 = vrot.slane %v673_v43, 4  ;;  %v686_v2 = vrot.slane %v670_v45, 4 }
  0xdd   : > { %v540_v3 = vadd.f32 %v539_v47, %v538_v28  ;;  %v692_v4 = vrot.slane %v671_v48, 4  ;;  %v543_v5 = vrot.slane %v487_v49, 4  ;;  %v549_v6 = vrot.slane %v488_v50, 4 }
  0xde   : > { %v524_v7 = vadd.f32 %v523_v51, %v522_v31  ;;  %v530_v8 = vadd.f32 %v529_v52, %v528_v32  ;;  %v333_v9 = vadd.f32 %v332_v53, %v331_v33  ;;  %v339_v10 = vadd.f32 %v338_v54, %v337_v34 }
  0xdf   : > { %v343_v11 = vadd.f32 %v342_v59, %v341_v40  ;;  %v349_v12 = vadd.f32 %v348_v60, %v347_v41  ;;  %v352_v13 = vrot.slane %v296_v61, 4  ;;  %v358_v15 = vrot.slane %v297_v62, 4  ;;  %v634_v41 = vpop.permute.xlu0 %633 }
  0xe0   : > { %v535_v17 = vrot.slane %v534_v63, 1  ;;  %v700_v18 = vrot.slane %v699_v0, 2  ;;  %v705_v19 = vadd.f32 %v704_v1, %v673_v43  ;;  %v687_v20 = vadd.f32 %v686_v2, %v670_v45 }
  0xe1   : > { %v541_v21 = vrot.slane %v540_v3, 1  ;;  %v693_v22 = vadd.f32 %v692_v4, %v671_v48  ;;  %v544_v23 = vadd.f32 %v543_v5, %v487_v49  ;;  %v550_v24 = vadd.f32 %v549_v6, %v488_v50 }
  0xe2   : > { %v1828_v25 = vadd.f32 %v512_v26, %v321_v36  ;;  %v1830_v28 = vadd.f32 %v518_v27, %v327_v39  ;;  %v1832_v31 = vadd.f32 %v524_v7, %v333_v9  ;;  %v1834_v32 = vadd.f32 %v530_v8, %v339_v10  ;;  %v641_v36 = vpop.permute.xlu1 %640 }
  0xe3   : > { %v344_v33 = vrot.slane %v343_v11, 1  ;;  %v350_v34 = vrot.slane %v349_v12, 1  ;;  %v353_v35 = vadd.f32 %v352_v13, %v296_v61  ;;  %v359_v40 = vadd.f32 %v358_v15, %v297_v62 }
  0xe4   : > { %v536_v42 = vadd.f32 %v535_v17, %v534_v63  ;;  %v701_v43 = vadd.f32 %v700_v18, %v699_v0  ;;  %v706_v44 = vrot.slane %v705_v19, 2  ;;  %v688_v45 = vrot.slane %v687_v20, 2 }
  0xe5   : > { %v542_v46 = vadd.f32 %v541_v21, %v540_v3  ;;  %v694_v47 = vrot.slane %v693_v22, 2  ;;  %v545_v48 = vrot.slane %v544_v23, 2  ;;  %v551_v26 = vrot.slane %v550_v24, 2  ;;  %v1847_v21 = vld [vmem:[%s1739_s28 + $0x30] sm:$0xff] }
  0xe6   : > { %v298_v27 = vmin.f32 %v273_v16, %v1784_v57  ;;  %v299_v39 = vmin.f32 %v273_v16, %v1787_v58  ;;  %v674_v49 = vmin.f32 %v634_v41, %v1812_v14  ;;  %v675_v50 = vmin.f32 %v634_v41, %v1816_v29  ;;  %v464_v16 = vpop.permute.xlu0 %463 }
  0xe7   : > { %v345_v51 = vadd.f32 %v344_v33, %v343_v11  ;;  %v351_v52 = vadd.f32 %v350_v34, %v349_v12  ;;  %v354_v53 = vrot.slane %v353_v35, 2  ;;  %v360_v54 = vrot.slane %v359_v40, 2 }
  0xe8   : > { %v702_v59 = vrot.slane %v701_v43, 1  ;;  %v707_v60 = vadd.f32 %v706_v44, %v705_v19  ;;  %v689_v61 = vadd.f32 %v688_v45, %v687_v20  ;;  %v676_v62 = vmin.f32 %v641_v36, %v1812_v14 }
  0xe9   : > { %v695_v63 = vadd.f32 %v694_v47, %v693_v22  ;;  %v546_v0 = vadd.f32 %v545_v48, %v544_v23  ;;  %v552_v1 = vadd.f32 %v551_v26, %v550_v24  ;;  %v677_v2 = vmin.f32 %v641_v36, %v1816_v29  ;;  %v818_v22 = vpop.permute.xlu1 %817 }
  0xea   : > { %v364_v3 = vrot.slane %v298_v27, 4  ;;  %v370_v4 = vrot.slane %v299_v39, 4  ;;  %v710_v5 = vrot.slane %v674_v49, 4  ;;  %v716_v6 = vrot.slane %v675_v50, 4 }
  0xeb   : > { %v1842_v7 = vadd.f32 %v536_v42, %v345_v51  ;;  %v1844_v8 = vadd.f32 %v542_v46, %v351_v52  ;;  %v355_v9 = vadd.f32 %v354_v53, %v353_v35  ;;  %v361_v10 = vadd.f32 %v360_v54, %v359_v40  ;;  %v811_v52 = vpop.permute.xlu0 %810 }
  0xec   : > { %v703_v11 = vadd.f32 %v702_v59, %v701_v43  ;;  %v708_v12 = vrot.slane %v707_v60, 1  ;;  %v690_v13 = vrot.slane %v689_v61, 1  ;;  %v722_v15 = vrot.slane %v676_v62, 4 }
  0xed   : > { %v696_v17 = vrot.slane %v695_v63, 1  ;;  %v547_v18 = vrot.slane %v546_v0, 1  ;;  %v553_v19 = vrot.slane %v552_v1, 1  ;;  %v728_v20 = vrot.slane %v677_v2, 4 }
  0xee   : > { %v365_v23 = vadd.f32 %v364_v3, %v298_v27  ;;  %v371_v24 = vadd.f32 %v370_v4, %v299_v39  ;;  %v711_v33 = vadd.f32 %v710_v5, %v674_v49  ;;  %v717_v34 = vadd.f32 %v716_v6, %v675_v50  ;;  %v1853_v27 = vld [vmem:[%s1739_s28 + $0x38] sm:$0xff] }
  0xef   : > { %v356_v41 = vrot.slane %v355_v9, 1  ;;  %v362_v35 = vrot.slane %v361_v10, 1  ;;  %v489_v40 = vmin.f32 %v464_v16, %v1778_v55  ;;  %v490_v42 = vmin.f32 %v464_v16, %v1781_v56 }
  0xf0   : > { %v709_v43 = vadd.f32 %v708_v12, %v707_v60  ;;  %v691_v44 = vadd.f32 %v690_v13, %v689_v61  ;;  %v723_v45 = vadd.f32 %v722_v15, %v676_v62  ;;  %v863_v46 = vmin.f32 %v818_v22, %v1847_v21 }
  0xf1   : > { %v697_v47 = vadd.f32 %v696_v17, %v695_v63  ;;  %v548_v48 = vadd.f32 %v547_v18, %v546_v0  ;;  %v554_v26 = vadd.f32 %v553_v19, %v552_v1  ;;  %v729_v36 = vadd.f32 %v728_v20, %v677_v2  ;;  %v280_v18 = vpop.permute.xlu0 %279 }
  0xf2   : > { %v366_v39 = vrot.slane %v365_v23, 2  ;;  %v372_v49 = vrot.slane %v371_v24, 2  ;;  %v712_v50 = vrot.slane %v711_v33, 2  ;;  %v718_v51 = vrot.slane %v717_v34, 2 }
  0xf3   : > { %v357_v53 = vadd.f32 %v356_v41, %v355_v9  ;;  %v363_v54 = vadd.f32 %v362_v35, %v361_v10  ;;  %v555_v59 = vrot.slane %v489_v40, 4  ;;  %v561_v3 = vrot.slane %v490_v42, 4 }
  0xf4   : > { %v1856_v60 = vadd.f32 %v703_v11, %v1828_v25  ;;  %v724_v61 = vrot.slane %v723_v45, 2  ;;  %v864_v62 = vmin.f32 %v818_v22, %v1853_v27  ;;  %v889_v63 = vrot.slane %v863_v46, 4  ;;  %v471_v25 = vpop.permute.xlu1 %470 }
  0xf5   : > { %v1860_v0 = vadd.f32 %v709_v43, %v1830_v28  ;;  %v1863_v1 = vadd.f32 %v691_v44, %v1797_v37  ;;  %v1866_v2 = vadd.f32 %v697_v47, %v1799_v38  ;;  %v730_v4 = vrot.slane %v729_v36, 2 }
  0xf6   : > { %v367_v5 = vadd.f32 %v366_v39, %v365_v23  ;;  %v373_v6 = vadd.f32 %v372_v49, %v371_v24  ;;  %v713_v9 = vadd.f32 %v712_v50, %v711_v33  ;;  %v719_v10 = vadd.f32 %v718_v51, %v717_v34 }
  0xf7   : > { %v1868_v11 = vadd.f32 %v548_v48, %v357_v53  ;;  %v1870_v12 = vadd.f32 %v554_v26, %v363_v54  ;;  %v556_v13 = vadd.f32 %v555_v59, %v489_v40  ;;  %v562_v15 = vadd.f32 %v561_v3, %v490_v42 }
  0xf8   : > { %v725_v28 = vadd.f32 %v724_v61, %v723_v45  ;;  %v890_v16 = vadd.f32 %v889_v63, %v863_v46  ;;  %v895_v17 = vrot.slane %v864_v62, 4  ;;  %v861_v37 = vmin.f32 %v811_v52, %v1847_v21  ;;  %v825_v3 = vpop.permute.xlu1 %824 }
  0xf9   : > { %2120 = vst [vmem:[#allocation13_spill] sm:$0xff] %v1870_v12  ;;  %v731_v38 = vadd.f32 %v730_v4, %v729_v36  ;;  %v862_v19 = vmin.f32 %v811_v52, %v1853_v27  ;;  %v491_v20 = vmin.f32 %v471_v25, %v1778_v55  ;;  %v492_v22 = vmin.f32 %v471_v25, %v1781_v56 }
  0xfa   : > { %v368_v23 = vrot.slane %v367_v5, 1  ;;  %v374_v24 = vrot.slane %v373_v6, 1  ;;  %v714_v33 = vrot.slane %v713_v9, 1  ;;  %v720_v34 = vrot.slane %v719_v10, 1 }
  0xfb   : > { %v557_v41 = vrot.slane %v556_v13, 2  ;;  %v563_v35 = vrot.slane %v562_v15, 2  ;;  %v300_v40 = vmin.f32 %v280_v18, %v1784_v57  ;;  %v301_v42 = vmin.f32 %v280_v18, %v1787_v58 }
  0xfc   : > { %v726_v43 = vrot.slane %v725_v28, 1  ;;  %v891_v44 = vrot.slane %v890_v16, 2  ;;  %v896_v45 = vadd.f32 %v895_v17, %v864_v62  ;;  %v877_v46 = vrot.slane %v861_v37, 4 }
  0xfd   : > { %v732_v47 = vrot.slane %v731_v38, 1  ;;  %v883_v48 = vrot.slane %v862_v19, 4  ;;  %v567_v26 = vrot.slane %v491_v20, 4  ;;  %v573_v36 = vrot.slane %v492_v22, 4 }
  0xfe   : > { %v369_v39 = vadd.f32 %v368_v23, %v367_v5  ;;  %v375_v49 = vadd.f32 %v374_v24, %v373_v6  ;;  %v715_v50 = vadd.f32 %v714_v33, %v713_v9  ;;  %v721_v51 = vadd.f32 %v720_v34, %v719_v10  ;;  %v478_v24 = vpop.permute.xlu1 %477 }
  0xff   : > { %v558_v52 = vadd.f32 %v557_v41, %v556_v13  ;;  %v564_v53 = vadd.f32 %v563_v35, %v562_v15  ;;  %v376_v54 = vrot.slane %v300_v40, 4  ;;  %v382_v59 = vrot.slane %v301_v42, 4 }
 0x100   : > { %v727_v61 = vadd.f32 %v726_v43, %v725_v28  ;;  %v892_v63 = vadd.f32 %v891_v44, %v890_v16  ;;  %v897_v4 = vrot.slane %v896_v45, 2  ;;  %v878_v25 = vadd.f32 %v877_v46, %v861_v37  ;;  %v648_v16 = vpop.permute.xlu0 %647 }
 0x101   : > { %v733_v18 = vadd.f32 %v732_v47, %v731_v38  ;;  %v884_v62 = vadd.f32 %v883_v48, %v862_v19  ;;  %v568_v17 = vadd.f32 %v567_v26, %v491_v20  ;;  %v574_v30 = vadd.f32 %v573_v36, %v492_v22 }
 0x102   : > { %v1879_v12 = vadd.f32 %v715_v50, %v1832_v31  ;;  %v1882_v5 = vadd.f32 %v721_v51, %v1834_v32  ;;  %v865_v6 = vmin.f32 %v825_v3, %v1847_v21  ;;  %v866_v9 = vmin.f32 %v825_v3, %v1853_v27 }
 0x103   : > { %v559_v10 = vrot.slane %v558_v52, 1  ;;  %v565_v13 = vrot.slane %v564_v53, 1  ;;  %v377_v15 = vadd.f32 %v376_v54, %v300_v40  ;;  %v383_v28 = vadd.f32 %v382_v59, %v301_v42 }
 0x104   : > { %v1887_v37 = vadd.f32 %v727_v61, %v1842_v7  ;;  %v893_v38 = vrot.slane %v892_v63, 1  ;;  %v898_v19 = vadd.f32 %v897_v4, %v896_v45  ;;  %v879_v20 = vrot.slane %v878_v25, 2 }
 0x105   : > { %v1890_v31 = vadd.f32 %v733_v18, %v1844_v8  ;;  %v885_v32 = vrot.slane %v884_v62, 2  ;;  %v569_v22 = vrot.slane %v568_v17, 2  ;;  %v575_v23 = vrot.slane %v574_v30, 2  ;;  %v287_v18 = vpop.permute.xlu0 %286 }
 0x106   : > { %v901_v33 = vrot.slane %v865_v6, 4  ;;  %v907_v34 = vrot.slane %v866_v9, 4  ;;  %v678_v41 = vmin.f32 %v648_v16, %v1812_v14  ;;  %v679_v35 = vmin.f32 %v648_v16, %v1816_v29 }
 0x107   : > { %v560_v40 = vadd.f32 %v559_v10, %v558_v52  ;;  %v566_v42 = vadd.f32 %v565_v13, %v564_v53  ;;  %v378_v7 = vrot.slane %v377_v15, 2  ;;  %v384_v43 = vrot.slane %v383_v28, 2 }
 0x108   : > { %v894_v44 = vadd.f32 %v893_v38, %v892_v63  ;;  %v899_v45 = vrot.slane %v898_v19, 1  ;;  %v880_v46 = vadd.f32 %v879_v20, %v878_v25  ;;  %v493_v8 = vmin.f32 %v478_v24, %v1778_v55 }
 0x109   : > { %v886_v47 = vadd.f32 %v885_v32, %v884_v62  ;;  %v570_v48 = vadd.f32 %v569_v22, %v568_v17  ;;  %v576_v26 = vadd.f32 %v575_v23, %v574_v30  ;;  %v494_v36 = vmin.f32 %v478_v24, %v1781_v56 }
 0x10a   : > { %v902_v50 = vadd.f32 %v901_v33, %v865_v6  ;;  %v908_v51 = vadd.f32 %v907_v34, %v866_v9  ;;  %v734_v54 = vrot.slane %v678_v41, 4  ;;  %v740_v59 = vrot.slane %v679_v35, 4  ;;  %v832_v6 = vpop.permute.xlu1 %831 }
 0x10b   : > { %v1896_v3 = vadd.f32 %v560_v40, %v369_v39  ;;  %v1898_v52 = vadd.f32 %v566_v42, %v375_v49  ;;  %v379_v53 = vadd.f32 %v378_v7, %v377_v15  ;;  %v385_v61 = vadd.f32 %v384_v43, %v383_v28  ;;  %v655_v40 = vpop.permute.xlu0 %654 }
 0x10c   : > { %v900_v63 = vadd.f32 %v899_v45, %v898_v19  ;;  %v1901_v4 = vadd.f32 %v894_v44, %v1856_v60  ;;  %v881_v55 = vrot.slane %v880_v46, 1  ;;  %v579_v25 = vrot.slane %v493_v8, 4 }
 0x10d   : > { %v887_v30 = vrot.slane %v886_v47, 1  ;;  %v571_v62 = vrot.slane %v570_v48, 1  ;;  %v577_v56 = vrot.slane %v576_v26, 1  ;;  %v585_v17 = vrot.slane %v494_v36, 4 }
 0x10e   : > { %v903_v9 = vrot.slane %v902_v50, 2  ;;  %v909_v10 = vrot.slane %v908_v51, 2  ;;  %v735_v39 = vadd.f32 %v734_v54, %v678_v41  ;;  %v741_v13 = vadd.f32 %v740_v59, %v679_v35  ;;  %v1922_v59 = vld [vmem:[%s1739_s28 + $0x48] sm:$0xff] }
 0x10f   : > { %v380_v49 = vrot.slane %v379_v53, 1  ;;  %v386_v16 = vrot.slane %v385_v61, 1  ;;  %v302_v15 = vmin.f32 %v287_v18, %v1784_v57  ;;  %v303_v28 = vmin.f32 %v287_v18, %v1787_v58 }
 0x110   : > { %v1906_v60 = vadd.f32 %v900_v63, %v1860_v0  ;;  %v882_v38 = vadd.f32 %v881_v55, %v880_v46  ;;  %v580_v19 = vadd.f32 %v579_v25, %v493_v8  ;;  %v867_v20 = vmin.f32 %v832_v6, %v1847_v21 }
 0x111   : > { %v888_v32 = vadd.f32 %v887_v30, %v886_v47  ;;  %v572_v22 = vadd.f32 %v571_v62, %v570_v48  ;;  %v578_v23 = vadd.f32 %v577_v56, %v576_v26  ;;  %v586_v24 = vadd.f32 %v585_v17, %v494_v36  ;;  %v1919_v26 = vld [vmem:[%s1739_s28 + $0x40] sm:$0xff]  ;;  %v1009_v36 = vpop.permute.xlu1 %1008  ;;  %v1002_v62 = vpop.permute.xlu0 %1001 }
 0x112   : > { %v904_v33 = vadd.f32 %v903_v9, %v902_v50  ;;  %v910_v34 = vadd.f32 %v909_v10, %v908_v51  ;;  %v736_v41 = vrot.slane %v735_v39, 2  ;;  %v742_v35 = vrot.slane %v741_v13, 2 }
 0x113   : > { %v381_v57 = vadd.f32 %v380_v49, %v379_v53  ;;  %v387_v42 = vadd.f32 %v386_v16, %v385_v61  ;;  %v388_v58 = vrot.slane %v302_v15, 4  ;;  %v394_v0 = vrot.slane %v303_v28, 4 }
 0x114   : > { %v1910_v7 = vadd.f32 %v882_v38, %v1863_v1  ;;  %v581_v43 = vrot.slane %v580_v19, 2  ;;  %v868_v44 = vmin.f32 %v832_v6, %v1853_v27  ;;  %v913_v45 = vrot.slane %v867_v20, 4 }
 0x115   : > { %v1914_v46 = vadd.f32 %v888_v32, %v1866_v2  ;;  %v587_v8 = vrot.slane %v586_v24, 2  ;;  %v680_v47 = vmin.f32 %v655_v40, %v1812_v14  ;;  %v681_v48 = vmin.f32 %v655_v40, %v1816_v29  ;;  %v839_v40 = vpop.permute.xlu1 %838 }
 0x116   : > { %v905_v50 = vrot.slane %v904_v33, 1  ;;  %v911_v51 = vrot.slane %v910_v34, 1  ;;  %v737_v54 = vadd.f32 %v736_v41, %v735_v39  ;;  %v743_v1 = vadd.f32 %v742_v35, %v741_v13 }
 0x117   : > { %v1924_v53 = vadd.f32 %v572_v22, %v381_v57  ;;  %v1926_v61 = vadd.f32 %v578_v23, %v387_v42  ;;  %v389_v2 = vadd.f32 %v388_v58, %v302_v15  ;;  %v395_v63 = vadd.f32 %v394_v0, %v303_v28 }
 0x118   : > { %v582_v55 = vadd.f32 %v581_v43, %v580_v19  ;;  %v914_v25 = vadd.f32 %v913_v45, %v867_v20  ;;  %v919_v18 = vrot.slane %v868_v44, 4  ;;  %v1054_v30 = vmin.f32 %v1009_v36, %v1919_v26 }
 0x119   : > { %v588_v56 = vadd.f32 %v587_v8, %v586_v24  ;;  %v746_v17 = vrot.slane %v680_v47, 4  ;;  %v752_v6 = vrot.slane %v681_v48, 4  ;;  %v1055_v9 = vmin.f32 %v1009_v36, %v1922_v59 }
 0x11a   : > { %v906_v10 = vadd.f32 %v905_v50, %v904_v33  ;;  %v912_v39 = vadd.f32 %v911_v51, %v910_v34  ;;  %v738_v13 = vrot.slane %v737_v54, 1  ;;  %v744_v49 = vrot.slane %v743_v1, 1 }
 0x11b   : > { %v390_v16 = vrot.slane %v389_v2, 2  ;;  %v396_v38 = vrot.slane %v395_v63, 2  ;;  %v1052_v15 = vmin.f32 %v1002_v62, %v1919_v26  ;;  %v1053_v28 = vmin.f32 %v1002_v62, %v1922_v59  ;;  %v2121_v62 = vld [vmem:[#allocation13_spill] sm:$0xff] }
 0x11c   : > { %v583_v19 = vrot.slane %v582_v55, 1  ;;  %v915_v20 = vrot.slane %v914_v25, 2  ;;  %v920_v32 = vadd.f32 %v919_v18, %v868_v44  ;;  %v1080_v22 = vrot.slane %v1054_v30, 4 }
 0x11d   : > { %v589_v23 = vrot.slane %v588_v56, 1  ;;  %v747_v24 = vadd.f32 %v746_v17, %v680_v47  ;;  %v753_v41 = vadd.f32 %v752_v6, %v681_v48  ;;  %v1086_v35 = vrot.slane %v1055_v9, 4 }
 0x11e   : > { %v739_v57 = vadd.f32 %v738_v13, %v737_v54  ;;  %v745_v33 = vadd.f32 %v744_v49, %v743_v1  ;;  %v1068_v34 = vrot.slane %v1052_v15, 4  ;;  %v1074_v42 = vrot.slane %v1053_v28, 4  ;;  %v662_v54 = vpop.permute.xlu0 %661 }
 0x11f   : > { %v1933_v58 = vadd.f32 %v906_v10, %v1879_v12  ;;  %v1936_v0 = vadd.f32 %v912_v39, %v1882_v5  ;;  %v391_v43 = vadd.f32 %v390_v16, %v389_v2  ;;  %v397_v45 = vadd.f32 %v396_v38, %v395_v63 }
 0x120   : > { %v584_v8 = vadd.f32 %v583_v19, %v582_v55  ;;  %v916_v44 = vadd.f32 %v915_v20, %v914_v25  ;;  %v921_v36 = vrot.slane %v920_v32, 2  ;;  %v1081_v50 = vadd.f32 %v1080_v22, %v1054_v30  ;;  %v669_v25 = vpop.permute.xlu1 %668 }
 0x121   : > { %v590_v47 = vadd.f32 %v589_v23, %v588_v56  ;;  %v748_v48 = vrot.slane %v747_v24, 2  ;;  %v754_v51 = vrot.slane %v753_v41, 2  ;;  %v1087_v18 = vadd.f32 %v1086_v35, %v1055_v9 }
 0x122   : > { %v1939_v1 = vadd.f32 %v739_v57, %v1868_v11  ;;  %v1942_v12 = vadd.f32 %v745_v33, %v2121_v62  ;;  %v1069_v17 = vadd.f32 %v1068_v34, %v1052_v15  ;;  %v1075_v5 = vadd.f32 %v1074_v42, %v1053_v28 }
 0x123   : > { %v392_v6 = vrot.slane %v391_v43, 1  ;;  %v398_v2 = vrot.slane %v397_v45, 1  ;;  %v869_v63 = vmin.f32 %v839_v40, %v1847_v21  ;;  %v870_v55 = vmin.f32 %v839_v40, %v1853_v27 }
 0x124   : > { %v917_v30 = vrot.slane %v916_v44, 1  ;;  %v922_v56 = vadd.f32 %v921_v36, %v920_v32  ;;  %v1082_v10 = vrot.slane %v1081_v50, 2  ;;  %v682_v9 = vmin.f32 %v662_v54, %v1812_v14 }
 0x125   : > { %v749_v39 = vadd.f32 %v748_v48, %v747_v24  ;;  %v755_v11 = vadd.f32 %v754_v51, %v753_v41  ;;  %v1088_v13 = vrot.slane %v1087_v18, 2  ;;  %v683_v49 = vmin.f32 %v662_v54, %v1816_v29 }
 0x126   : > { %v1070_v16 = vrot.slane %v1069_v17, 2  ;;  %v1076_v38 = vrot.slane %v1075_v5, 2  ;;  %v684_v15 = vmin.f32 %v669_v25, %v1812_v14  ;;  %v685_v28 = vmin.f32 %v669_v25, %v1816_v29 }
 0x127   : > { %v393_v19 = vadd.f32 %v392_v6, %v391_v43  ;;  %v399_v20 = vadd.f32 %v398_v2, %v397_v45  ;;  %v925_v22 = vrot.slane %v869_v63, 4  ;;  %v931_v23 = vrot.slane %v870_v55, 4  ;;  %v1016_v6 = vpop.permute.xlu0 %1015 }
 0x128   : > { %v918_v35 = vadd.f32 %v917_v30, %v916_v44  ;;  %v923_v32 = vrot.slane %v922_v56, 1  ;;  %v1083_v40 = vadd.f32 %v1082_v10, %v1081_v50  ;;  %v758_v57 = vrot.slane %v682_v9, 4 }
 0x129   : > { %v750_v33 = vrot.slane %v749_v39, 1  ;;  %v1089_v24 = vadd.f32 %v1088_v13, %v1087_v18  ;;  %v764_v41 = vrot.slane %v683_v49, 4  ;;  %v770_v34 = vrot.slane %v684_v15, 4 }
 0x12a   : > { %v756_v42 = vrot.slane %v755_v11, 1  ;;  %v1071_v36 = vadd.f32 %v1070_v16, %v1069_v17  ;;  %v1077_v48 = vadd.f32 %v1076_v38, %v1075_v5  ;;  %v776_v51 = vrot.slane %v685_v28, 4  ;;  %v1023_v17 = vpop.permute.xlu1 %1022 }
 0x12b   : > { %v1950_v54 = vadd.f32 %v584_v8, %v393_v19  ;;  %v1952_v14 = vadd.f32 %v590_v47, %v399_v20  ;;  %v926_v29 = vadd.f32 %v925_v22, %v869_v63  ;;  %v932_v43 = vadd.f32 %v931_v23, %v870_v55 }
 0x12c   : > { %v924_v45 = vadd.f32 %v923_v32, %v922_v56  ;;  %v1955_v44 = vadd.f32 %v918_v35, %v1887_v37  ;;  %v1084_v50 = vrot.slane %v1083_v40, 1  ;;  %v759_v62 = vadd.f32 %v758_v57, %v682_v9 }
 0x12d   : > { %v751_v18 = vadd.f32 %v750_v33, %v749_v39  ;;  %v1090_v2 = vrot.slane %v1089_v24, 1  ;;  %v765_v25 = vadd.f32 %v764_v41, %v683_v49  ;;  %v771_v30 = vadd.f32 %v770_v34, %v684_v15 }
 0x12e   : > { %v757_v5 = vadd.f32 %v756_v42, %v755_v11  ;;  %v1072_v10 = vrot.slane %v1071_v36, 1  ;;  %v1078_v8 = vrot.slane %v1077_v48, 1  ;;  %v777_v13 = vadd.f32 %v776_v51, %v685_v28 }
 0x12f   : > { %v927_v47 = vrot.slane %v926_v29, 2  ;;  %v933_v16 = vrot.slane %v932_v43, 2  ;;  %v1056_v63 = vmin.f32 %v1016_v6, %v1919_v26  ;;  %v1057_v55 = vmin.f32 %v1016_v6, %v1922_v59 }
 0x130   : > { %v1960_v37 = vadd.f32 %v924_v45, %v1890_v31  ;;  %v1085_v56 = vadd.f32 %v1084_v50, %v1083_v40  ;;  %v760_v9 = vrot.slane %v759_v62, 2  ;;  %v1058_v39 = vmin.f32 %v1023_v17, %v1919_v26  ;;  %v846_v40 = vpop.permute.xlu0 %845 }
 0x131   : > { %v766_v49 = vrot.slane %v765_v25, 2  ;;  %v772_v38 = vrot.slane %v771_v30, 2  ;;  %v1092_v15 = vrot.slane %v1056_v63, 4  ;;  %v1098_v11 = vrot.slane %v1057_v55, 4 }
 0x132   : > { %v1964_v19 = vadd.f32 %v751_v18, %v1896_v3  ;;  %v1967_v28 = vadd.f32 %v757_v5, %v1898_v52  ;;  %v1091_v20 = vadd.f32 %v1090_v2, %v1089_v24  ;;  %v778_v22 = vrot.slane %v777_v13, 2 }
 0x133   : > { %v1073_v23 = vadd.f32 %v1072_v10, %v1071_v36  ;;  %v1079_v35 = vadd.f32 %v1078_v8, %v1077_v48  ;;  %v928_v31 = vadd.f32 %v927_v47, %v926_v29  ;;  %v934_v32 = vadd.f32 %v933_v16, %v932_v43  ;;  %v1030_v10 = vpop.permute.xlu1 %1029 }
 0x134   : > { %v1166_v57 = vadd.f32 %v1085_v56, %v1901_v4  ;;  %v761_v33 = vadd.f32 %v760_v9, %v759_v62  ;;  %v1059_v41 = vmin.f32 %v1023_v17, %v1922_v59  ;;  %v1104_v34 = vrot.slane %v1058_v39, 4  ;;  %v2122_v62 = vld [vmem:[#allocation12_spill] sm:$0xff]  ;;  %v853_v56 = vpop.permute.xlu0 %852 }
 0x135   : > { %v767_v42 = vadd.f32 %v766_v49, %v765_v25  ;;  %v773_v3 = vadd.f32 %v772_v38, %v771_v30  ;;  %v1093_v51 = vadd.f32 %v1092_v15, %v1056_v63  ;;  %v1099_v45 = vadd.f32 %v1098_v11, %v1057_v55 }
 0x136   : > { %v1167_v52 = vadd.f32 %v1091_v20, %v1906_v60  ;;  %v779_v24 = vadd.f32 %v778_v22, %v777_v13  ;;  %v871_v36 = vmin.f32 %v846_v40, %v1847_v21  ;;  %v872_v48 = vmin.f32 %v846_v40, %v1853_v27 }
 0x137   : > { %v1164_v29 = vadd.f32 %v1073_v23, %v1910_v7  ;;  %v1165_v4 = vadd.f32 %v1079_v35, %v1914_v46  ;;  %v929_v43 = vrot.slane %v928_v31, 1  ;;  %v935_v50 = vrot.slane %v934_v32, 1 }
 0x138   : > { %v1183_v6 = vmul.f32 %v2122_v62, %v1166_v57  ;;  %v762_v18 = vrot.slane %v761_v33, 1  ;;  %v1105_v2 = vadd.f32 %v1104_v34, %v1058_v39  ;;  %v1110_v25 = vrot.slane %v1059_v41, 4 }
 0x139   : > { %v768_v30 = vrot.slane %v767_v42, 1  ;;  %v774_v17 = vrot.slane %v773_v3, 1  ;;  %v1094_v5 = vrot.slane %v1093_v51, 2  ;;  %v1100_v60 = vrot.slane %v1099_v45, 2 }
 0x13a   : > { %v1184_v8 = vmul.f32 %v2122_v62, %v1167_v52  ;;  %v780_v13 = vrot.slane %v779_v24, 1  ;;  %v937_v47 = vrot.slane %v871_v36, 4  ;;  %v943_v16 = vrot.slane %v872_v48, 4 }
 0x13b   : > { %v1181_v7 = vmul.f32 %v2122_v62, %v1164_v29  ;;  %v1182_v46 = vmul.f32 %v2122_v62, %v1165_v4  ;;  %v930_v63 = vadd.f32 %v929_v43, %v928_v31  ;;  %v936_v55 = vadd.f32 %v935_v50, %v934_v32 }
 0x13c   : > { %v763_v9 = vadd.f32 %v762_v18, %v761_v33  ;;  %v1106_v39 = vrot.slane %v1105_v2, 2  ;;  %v1111_v49 = vadd.f32 %v1110_v25, %v1059_v41  ;;  %v1060_v38 = vmin.f32 %v1030_v10, %v1919_v26 }
 0x13d   : > { %v769_v15 = vadd.f32 %v768_v30, %v767_v42  ;;  %v775_v11 = vadd.f32 %v774_v17, %v773_v3  ;;  %v1095_v20 = vadd.f32 %v1094_v5, %v1093_v51  ;;  %v1101_v22 = vadd.f32 %v1100_v60, %v1099_v45  ;;  %v1037_v45 = vpop.permute.xlu1 %1036 }
 0x13e   : > { %v781_v23 = vadd.f32 %v780_v13, %v779_v24  ;;  %v938_v35 = vadd.f32 %v937_v47, %v871_v36  ;;  %v944_v40 = vadd.f32 %v943_v16, %v872_v48  ;;  %v1061_v57 = vmin.f32 %v1030_v10, %v1922_v59 }
 0x13f   : > { %v1983_v34 = vsel %vm1213_vm0, %v1183_v6, %v1181_v7  ;;  %v1986_v31 = vsel %vm1213_vm0, %v1184_v8, %v1182_v46  ;;  %v1989_v32 = vadd.f32 %v930_v63, %v1939_v1  ;;  %v1992_v33 = vadd.f32 %v936_v55, %v1942_v12  ;;  %v860_v1 = vpop.permute.xlu0 %859 }
 0x140   : > { %v1995_v41 = vadd.f32 %v763_v9, %v1924_v53  ;;  %v1107_v42 = vadd.f32 %v1106_v39, %v1105_v2  ;;  %v1112_v3 = vrot.slane %v1111_v49, 2  ;;  %v1116_v51 = vrot.slane %v1060_v38, 4 }
 0x141   : > { %v1998_v52 = vadd.f32 %v769_v15, %v1926_v61  ;;  %v2001_v24 = vadd.f32 %v775_v11, %v1950_v54  ;;  %v1096_v36 = vrot.slane %v1095_v20, 1  ;;  %v1102_v48 = vrot.slane %v1101_v22, 1  ;;  %v1051_v63 = vpop.permute.xlu1 %1050 }
 0x142   : > { %v2004_v29 = vadd.f32 %v781_v23, %v1952_v14  ;;  %v939_v12 = vrot.slane %v938_v35, 2  ;;  %v945_v4 = vrot.slane %v944_v40, 2  ;;  %v1122_v53 = vrot.slane %v1061_v57, 4 }
 0x143   : > { %v873_v43 = vmin.f32 %v853_v56, %v1847_v21  ;;  %v874_v50 = vmin.f32 %v853_v56, %v1853_v27  ;;  %v1062_v6 = vmin.f32 %v1037_v45, %v1919_v26  ;;  %v1063_v61 = vmin.f32 %v1037_v45, %v1922_v59 }
 0x144   : > { %v1108_v18 = vrot.slane %v1107_v42, 1  ;;  %v1113_v54 = vadd.f32 %v1112_v3, %v1111_v49  ;;  %v1117_v2 = vadd.f32 %v1116_v51, %v1060_v38  ;;  %v875_v25 = vmin.f32 %v860_v1, %v1847_v21 }
 0x145   : > { %v1097_v30 = vadd.f32 %v1096_v36, %v1095_v20  ;;  %v1103_v17 = vadd.f32 %v1102_v48, %v1101_v22  ;;  %v1128_v14 = vrot.slane %v1062_v6, 4  ;;  %v1134_v5 = vrot.slane %v1063_v61, 4 }
 0x146   : > { %v1123_v60 = vadd.f32 %v1122_v53, %v1061_v57  ;;  %v949_v10 = vrot.slane %v873_v43, 4  ;;  %v876_v8 = vmin.f32 %v860_v1, %v1853_v27  ;;  %v961_v13 = vrot.slane %v875_v25, 4 }
 0x147   : > { %v940_v47 = vadd.f32 %v939_v12, %v938_v35  ;;  %v955_v16 = vrot.slane %v874_v50, 4  ;;  %v1129_v7 = vadd.f32 %v1128_v14, %v1062_v6  ;;  %v1135_v46 = vadd.f32 %v1134_v5, %v1063_v61  ;;  %v1044_v14 = vpop.permute.xlu0 %1043 }
 0x148   : > { %v1109_v55 = vadd.f32 %v1108_v18, %v1107_v42  ;;  %v946_v56 = vadd.f32 %v945_v4, %v944_v40  ;;  %v962_v9 = vadd.f32 %v961_v13, %v875_v25  ;;  %v967_v39 = vrot.slane %v876_v8, 4 }
 0x149   : > { %v1168_v21 = vadd.f32 %v1097_v30, %v1933_v58  ;;  %v1169_v49 = vadd.f32 %v1103_v17, %v1936_v0  ;;  %v1114_v38 = vrot.slane %v1113_v54, 1  ;;  %v1118_v15 = vrot.slane %v1117_v2, 2 }
 0x14a   : > { %v1124_v11 = vrot.slane %v1123_v60, 2  ;;  %v950_v20 = vadd.f32 %v949_v10, %v873_v43  ;;  %v968_v22 = vadd.f32 %v967_v39, %v876_v8  ;;  %v1066_v27 = vmin.f32 %v1051_v63, %v1919_v26 }
 0x14b   : > { %v941_v23 = vrot.slane %v940_v47, 1  ;;  %v956_v35 = vadd.f32 %v955_v16, %v874_v50  ;;  %v1130_v57 = vrot.slane %v1129_v7, 2  ;;  %v1136_v3 = vrot.slane %v1135_v46, 2 }
 0x14c   : > { %v963_v51 = vrot.slane %v962_v9, 2  ;;  %v969_v42 = vrot.slane %v968_v22, 2  ;;  %v1067_v40 = vmin.f32 %v1051_v63, %v1922_v59  ;;  %v1152_v45 = vrot.slane %v1066_v27, 4 }
 0x14d   : > { %v1115_v36 = vadd.f32 %v1114_v38, %v1113_v54  ;;  %v1170_v58 = vadd.f32 %v1109_v55, %v1955_v44  ;;  %v947_v0 = vrot.slane %v946_v56, 1  ;;  %v1119_v48 = vadd.f32 %v1118_v15, %v1117_v2 }
 0x14e   : > { %v1125_v1 = vadd.f32 %v1124_v11, %v1123_v60  ;;  %v951_v12 = vrot.slane %v950_v20, 2  ;;  %v1153_v4 = vadd.f32 %v1152_v45, %v1066_v27  ;;  %v1158_v53 = vrot.slane %v1067_v40, 4 }
 0x14f   : > { %v1185_v43 = vmul.f32 %v2122_v62, %v1168_v21  ;;  %v957_v6 = vrot.slane %v956_v35, 2  ;;  %v1131_v50 = vadd.f32 %v1130_v57, %v1129_v7  ;;  %v1137_v61 = vadd.f32 %v1136_v3, %v1135_v46 }
 0x150   : > { %v964_v18 = vadd.f32 %v963_v51, %v962_v9  ;;  %v970_v25 = vadd.f32 %v969_v42, %v968_v22  ;;  %v1154_v30 = vrot.slane %v1153_v4, 2  ;;  %v1159_v17 = vadd.f32 %v1158_v53, %v1067_v40 }
 0x151   : > { %v2019_v54 = vmul.f32 %v2122_v62, %v1169_v49  ;;  %v942_v44 = vadd.f32 %v941_v23, %v940_v47  ;;  %v948_v5 = vadd.f32 %v947_v0, %v946_v56  ;;  %v1120_v2 = vrot.slane %v1119_v48, 1 }
 0x152   : > { %v1126_v60 = vrot.slane %v1125_v1, 1  ;;  %v952_v10 = vadd.f32 %v951_v12, %v950_v20  ;;  %v1155_v8 = vadd.f32 %v1154_v30, %v1153_v4  ;;  %v1160_v13 = vrot.slane %v1159_v17, 2 }
 0x153   : > { %v958_v16 = vadd.f32 %v957_v6, %v956_v35  ;;  %v1132_v63 = vrot.slane %v1131_v50, 1  ;;  %v1064_v7 = vmin.f32 %v1044_v14, %v1919_v26  ;;  %v1065_v46 = vmin.f32 %v1044_v14, %v1922_v59 }
 0x154   : > { %v1138_v55 = vrot.slane %v1137_v61, 1  ;;  %v965_v9 = vrot.slane %v964_v18, 1  ;;  %v971_v39 = vrot.slane %v970_v25, 1  ;;  %v1161_v21 = vadd.f32 %v1160_v13, %v1159_v17 }
 0x155   : > { %v1171_v47 = vadd.f32 %v1115_v36, %v1960_v37  ;;  %v1187_v56 = vmul.f32 %v2122_v62, %v1170_v58  ;;  %v1140_v49 = vrot.slane %v1064_v7, 4  ;;  %v1146_v38 = vrot.slane %v1065_v46, 4 }
 0x156   : > { %v1121_v15 = vadd.f32 %v1120_v2, %v1119_v48  ;;  %v1127_v11 = vadd.f32 %v1126_v60, %v1125_v1  ;;  %v1156_v20 = vrot.slane %v1155_v8, 1  ;;  %v1162_v22 = vrot.slane %v1161_v21, 1 }
 0x157   : > { %v953_v27 = vrot.slane %v952_v10, 1  ;;  %v959_v26 = vrot.slane %v958_v16, 1  ;;  %v1141_v23 = vadd.f32 %v1140_v49, %v1064_v7  ;;  %v1147_v59 = vadd.f32 %v1146_v38, %v1065_v46 }
 0x158   : > { %v1133_v35 = vadd.f32 %v1132_v63, %v1131_v50  ;;  %v1139_v57 = vadd.f32 %v1138_v55, %v1137_v61  ;;  %v966_v3 = vadd.f32 %v965_v9, %v964_v18  ;;  %v972_v51 = vadd.f32 %v971_v39, %v970_v25 }
 0x159   : > { %v983_v42 = vadd.f32 %v942_v44, %v1964_v19  ;;  %v984_v37 = vadd.f32 %v948_v5, %v1967_v28  ;;  %v1142_v40 = vrot.slane %v1141_v23, 2  ;;  %v1148_v45 = vrot.slane %v1147_v59, 2 }
 0x15a   : > { %v1172_v36 = vadd.f32 %v1121_v15, %v1989_v32  ;;  %v1173_v58 = vadd.f32 %v1127_v11, %v1992_v33  ;;  %v1157_v0 = vadd.f32 %v1156_v20, %v1155_v8  ;;  %v1163_v48 = vadd.f32 %v1162_v22, %v1161_v21 }
 0x15b   : > { %v954_v1 = vadd.f32 %v953_v27, %v952_v10  ;;  %v960_v12 = vadd.f32 %v959_v26, %v958_v16  ;;  %v1143_v4 = vadd.f32 %v1142_v40, %v1141_v23  ;;  %v1149_v53 = vadd.f32 %v1148_v45, %v1147_v59 }
 0x15c   : > { %v1174_v6 = vadd.f32 %v1133_v35, %v983_v42  ;;  %v1175_v50 = vadd.f32 %v1139_v57, %v984_v37  ;;  %v987_v61 = vadd.f32 %v966_v3, %v2001_v24  ;;  %v988_v19 = vadd.f32 %v972_v51, %v2004_v29 }
 0x15d   : > { %v1216_v28 = vsel %vm1215_vm1, %v1185_v43, %v1983_v34  ;;  %v1188_v32 = vmul.f32 %v2122_v62, %v1171_v47  ;;  %v1144_v18 = vrot.slane %v1143_v4, 1  ;;  %v1150_v33 = vrot.slane %v1149_v53, 1 }
 0x15e   : > { %v1189_v25 = vmul.f32 %v2122_v62, %v1172_v36  ;;  %v1190_v30 = vmul.f32 %v2122_v62, %v1173_v58  ;;  %v1178_v17 = vadd.f32 %v1157_v0, %v987_v61  ;;  %v1179_v14 = vadd.f32 %v1163_v48, %v988_v19 }
 0x15f   : > { %v985_v44 = vadd.f32 %v954_v1, %v1995_v41  ;;  %v986_v24 = vadd.f32 %v960_v12, %v1998_v52  ;;  %v1145_v29 = vadd.f32 %v1144_v18, %v1143_v4  ;;  %v1151_v5 = vadd.f32 %v1150_v33, %v1149_v53 }
 0x160   : > { %v1228_v34 = vsel %vm1215_vm1, %v2019_v54, %v1986_v31  ;;  %v1218_v43 = vsel %vm1217_vm2, %v1187_v56, %v1216_v28  ;;  %v1191_v2 = vmul.f32 %v2122_v62, %v1174_v6  ;;  %v1192_v60 = vmul.f32 %v2122_v62, %v1175_v50 }
 0x161   : > { %v1229_v10 = vsel %vm1217_vm2, %v1188_v32, %v1228_v34  ;;  %v1176_v8 = vadd.f32 %v1145_v29, %v985_v44  ;;  %v1177_v13 = vadd.f32 %v1151_v5, %v986_v24  ;;  %v1220_v41 = vsel %vm1219_vm3, %v1189_v25, %v1218_v43 }
 0x162   : > { %v1195_v52 = vmul.f32 %v2122_v62, %v1178_v17  ;;  %v1196_v16 = vmul.f32 %v2122_v62, %v1179_v14  ;;  %v1230_v31 = vsel %vm1219_vm3, %v1190_v30, %v1229_v10  ;;  %v1222_v7 = vsel %vm1221_vm4, %v1191_v2, %v1220_v41 }
 0x163   : > { %v1193_v54 = vmul.f32 %v2122_v62, %v1176_v8  ;;  %v1194_v63 = vmul.f32 %v2122_v62, %v1177_v13  ;;  %v1231_v46 = vsel %vm1221_vm4, %v1192_v60, %v1230_v31 }
 0x165   : > { %v1224_v55 = vsel %vm1223_vm5, %v1193_v54, %v1222_v7  ;;  %v1232_v9 = vsel %vm1223_vm5, %v1194_v63, %v1231_v46 }
 0x166   : > { %v1226_v39 = vsel %vm1225_vm6, %v1195_v52, %v1224_v55  ;;  %v1233_v21 = vsel %vm1225_vm6, %v1196_v16, %v1232_v9 }
 0x167   : > { %1236 = vst [vmem:[%s222_s26] sm:$0xff] %v1226_v39  ;;  %1237 = vst [vmem:[%s222_s26 + $0x8] sm:$0xff] %v1233_v21 }
 0x168   : > { %1523 = shalt.err (!%p1520_p6)
}
 0x169   : > { %s1524_s10 = scalar_lea.hbm %s2056_s4, 256  ;;  %s1528_s0 = scalar_lea.hbm %s2107_s3, 512 }
 0x16a   : > { %p1525_p4 = scmp.ne.s32.totalorder %s2056_s4, %s1524_s10  ;;  %p1529_p0 = scmp.lt.s32.totalorder %s2056_s4, %s2107_s3 }
 0x16b   : > { %p1530_p3 = scmp.lt.s32.totalorder %s1528_s0, %s1524_s10 }
 0x16c   : > { %p1526_p9 = pnand %p1525_p4, %p1709_p13 }
 0x16d   : > { %p1531_p1 = por %p1530_p3, %p1529_p0 }
 0x16e   : > { %p1527_p12 = pneg %p1526_p9 }
 0x170   : > { %p1532_p8 = pnand %p1531_p1, %p1527_p12 }
 0x172   : > { %1535 = shalt.err (!%p1532_p8)
}
 0x173   : > { %1385 = dma.vmem_to_hbm [thread:$0]  (%p1709_p13), %s2058_s27, 256, %s2056_s4, %s1239_s17  }
 0x174 PF: > { %s1267_s21 = sand.u32 1, %s1574_s14   ;;  %p2123_p11 = scmp.ne.s32.totalorder %s2113_s24, 0 }
 0x175   : > { %s1268_s23 = scalar_lea.sflag [#allocation5], %s1267_s21 }
 0x176   : > { %p1396_p2 = pnand %p1357_p10, %p2123_p11 }
 0x178   : > { %p1397_p5 = pneg %p1396_p2 }
 0x17a   : > { %1569 = dma.done.wait (%p1397_p5), %s1268_s23, 256  }
 0x17b   : > { %1571 = vsyncadd (%p1397_p5), %s1268_s23, 4294967040  ;;  %s21_s19 = sadd.s32 1, %s1594_s19   ;;  %s2124_s14 = smov %s1578_s15 }
 0x17c   : > { %p18_p7 = scmp.ge.s32.totalorder %s21_s19, 4   ;;  %s2125_s15 = smov %s1582_s16 }
 0x17d   : > { %s2126_s16 = smov %s1718_s13  ;;  %s2127_s17 = smov %s1590_s18 }
 0x17e   : > { %s2128_s18 = smov %s2130_s29  ;;  %20 = sbr.rel (!%p18_p7) target bundleno = 9 (0x9), region = 90 }
 0x183   :  { %1273 = vsyncpa [#allocation4], 1 }
 0x184   :  { %1275 = vsyncpa [#allocation4 + $0x1], 1 }
 0x185   :  { %1276 = vsyncpa [#allocation7], 1 }
 0x186   :  { %1277 = vsyncpa [#allocation5], 1 }
 0x187   :  { %1279 = vsyncpa [#allocation5 + $0x1], 1 }

</bundles_post_ra>
